<compile_context>
chip_gen: v7x
topology: tpu7x:2x2x1
jax: 0.10.0
libtpu: 0.0.40
codegen_flags: <defaults>
</compile_context>

<pallas_src>
import functools

import jax
import jax.numpy as jnp
from jax import lax
from jax.experimental import pallas as pl
from jax.experimental.pallas import tpu as pltpu

NUM_BLOCKS = 3
KSIZE = 3
RES_SCALE = 0.1
SUBLANE = 8


@functools.cache
def _roll_matches_jnp() -> bool:
    """One-time probe of pltpu.roll's rotation convention.

    We rely on jnp.roll semantics (result[i] == x[(i - shift) % n]) to realise
    the conv halo as lane rotations; this tiny guard keeps the main kernel
    correct regardless of the Mosaic rotate direction convention.
    """
    def probe(x_ref, o_ref):
        o_ref[...] = pltpu.roll(x_ref[...], 1, axis=1)

    x = jnp.tile(jnp.arange(128, dtype=jnp.float32)[None, :], (SUBLANE, 1))
    y = pl.pallas_call(
        probe, out_shape=jax.ShapeDtypeStruct((SUBLANE, 128), jnp.float32))(x)
    return bool(y[0, 0] == 127.0)


def multires_kernel(x_ref, w_ref, o_ref, *, H, W, roll_is_jnp):
    # x_ref/o_ref: (C_pad, nb*H*W) f32 slab (channels on sublanes, pixels of nb
    #              images concatenated on lanes).
    # w_ref:       (6, C_pad, (1+9)*C_pad) packed matmul weights (bias in col 0,
    #              res_scale already folded into the 2nd conv of each block).
    C_pad, L = x_ref.shape
    HW = H * W
    x = x_ref[...].astype(jnp.float32)

    # ---- hoisted, precombined per-tap validity masks (computed once) ----
    flat = lax.broadcasted_iota(jnp.int32, (1, L), 1)
    pos = jnp.bitwise_and(flat, HW - 1) if (HW & (HW - 1)) == 0 else flat % HW
    col = jnp.bitwise_and(pos, W - 1) if (W & (W - 1)) == 0 else pos % W
    row_ok = {-1: pos >= W, 0: None, 1: pos < (H - 1) * W}
    col_ok = {-1: col >= 1, 0: None, 1: col <= W - 2}
    masks = {}
    for dy in (-1, 0, 1):
        for dx in (-1, 0, 1):
            r, c = row_ok[dy], col_ok[dx]
            masks[(dy, dx)] = c if r is None else (r if c is None else
                                                   jnp.logical_and(r, c))

    # Row 0 of the tap stack is all ones -> weight column 0 carries the bias.
    bias_rows = (lax.broadcasted_iota(jnp.int32, (C_pad, L), 0) == 0
                 ).astype(jnp.float32)

    sign = -1 if roll_is_jnp else 1

    def conv3x3(h, k):
        """3x3 'same' conv + bias as one MXU matmul over the shifted-tap stack."""
        pieces = [bias_rows]
        for dy in (-1, 0, 1):
            for dx in (-1, 0, 1):
                s = dy * W + dx
                # result[:, p] = h[:, p + s]  (in-register halo via XLU rotation)
                tap = h if s == 0 else pltpu.roll(h, (sign * s) % L, axis=1)
                m = masks[(dy, dx)]
                if m is not None:
                    tap = jnp.where(m, tap, 0.0)          # zero-padding semantics
                pieces.append(tap)
        patch = jnp.concatenate(pieces, axis=0)           # ((1+9)*C_pad, L)
        return jnp.dot(w_ref[k], patch, preferred_element_type=jnp.float32)

    h = x
    for blk in range(NUM_BLOCKS):
        y = conv3x3(h, 2 * blk)
        y = jnp.maximum(y, 0.0)                           # ReLU between the convs
        y = conv3x3(y, 2 * blk + 1)                       # res_scale folded into weights
        h = h + y                                         # ResBlock residual
    o_ref[...] = (h + x).astype(o_ref.dtype)              # MultiResBlock residual


def _pack_weights(weights, biases, C, C_pad):
    """Pack the 6 HWIO convs (+bias) into (6, C_pad, (1+9)*C_pad) matmul weights.

    Tap stack layout (rows): [ones block | tap(ky=0,kx=0) | ... | tap(2,2)],
    each block C_pad rows (real channels first, zero-padded).  RES_SCALE is
    folded into the second conv of every ResBlock.
    """
    kw = (1 + KSIZE * KSIZE) * C_pad
    mats = []
    for k in range(2 * NUM_BLOCKS):
        w = jnp.asarray(weights[k], jnp.float32)          # (3,3,C,C): [ky,kx,ci,co]
        b = jnp.asarray(biases[k], jnp.float32)           # (C,)
        if k % 2 == 1:                                    # 2nd conv of a ResBlock
            w = w * RES_SCALE
            b = b * RES_SCALE
        m = jnp.zeros((C_pad, kw), jnp.float32)
        m = m.at[:C, 0].set(b)                            # bias * ones-row
        for t in range(KSIZE * KSIZE):
            ky, kx = divmod(t, KSIZE)
            base = (1 + t) * C_pad
            m = m.at[:C, base:base + C].set(w[ky, kx].T)  # (co, ci)
        mats.append(m)
    return jnp.stack(mats)                                # (6, C_pad, kw)


def multires_block(x_nchw, weights, biases):
    """weights: list of 6 (3,3,C,C) HWIO arrays; biases: list of 6 (C,) arrays."""
    N, C, H, W = x_nchw.shape
    HW = H * W
    C_pad = ((C + SUBLANE - 1) // SUBLANE) * SUBLANE      # 4 -> 8: same vreg count,
                                                          # aligned matmul shapes
    # Whole batch in one grid step when it fits comfortably; otherwise chunk the
    # batch (chunks stay lane-dense multiples of HW; axis is "parallel" for v7x).
    nb = N
    while nb > 1 and (N % nb != 0 or 12 * nb * HW * C_pad * 4 > (8 << 20)):
        nb -= 1
    L = nb * HW
    grid = (N // nb,)

    # Channel-major, lane-dense layout: sublanes = (zero-padded) channels,
    # lanes = (image, flat pixel).
    x_cl = jnp.transpose(x_nchw, (1, 0, 2, 3)).reshape(C, N * HW).astype(jnp.float32)
    x_cl = jnp.pad(x_cl, ((0, C_pad - C), (0, 0)))

    w_packed = _pack_weights(weights, biases, C, C_pad)
    kw = w_packed.shape[-1]

    out = pl.pallas_call(
        functools.partial(multires_kernel, H=H, W=W,
                          roll_is_jnp=_roll_matches_jnp()),
        out_shape=jax.ShapeDtypeStruct((C_pad, N * HW), jnp.float32),
        grid=grid,
        in_specs=[
            pl.BlockSpec((C_pad, L), lambda i: (0, i)),
            pl.BlockSpec((2 * NUM_BLOCKS, C_pad, kw), lambda i: (0, 0, 0)),
        ],
        out_specs=pl.BlockSpec((C_pad, L), lambda i: (0, i)),
        compiler_params=pltpu.CompilerParams(
            dimension_semantics=("parallel",)),           # batch chunks across TCs
    )(x_cl, w_packed)

    out = out[:C].reshape(C, N, H, W).transpose(1, 0, 2, 3)
    return out.astype(x_nchw.dtype)


def multires_block_reference(x_nchw, weights, biases):
    """Pure-JAX reference (XLA conv) with identical semantics."""
    def conv(h, w, b):
        y = lax.conv_general_dilated(
            h, w, window_strides=(1, 1), padding="SAME",
            dimension_numbers=("NCHW", "HWIO", "NCHW"))
        return y + b[None, :, None, None]

    h = x_nchw
    for blk in range(NUM_BLOCKS):
        y = conv(h, weights[2 * blk], biases[2 * blk])
        y = jnp.maximum(y, 0.0)
        y = conv(y, weights[2 * blk + 1], biases[2 * blk + 1])
        h = h + RES_SCALE * y
    return h + x_nchw


if __name__ == "__main__":
    key = jax.random.PRNGKey(0)
    N, C, H, W = 2, 4, 16, 16

    keys = jax.random.split(key, 1 + 4 * NUM_BLOCKS)
    x = jax.random.normal(keys[0], (N, C, H, W), jnp.float32)

    weights, biases = [], []
    for i in range(2 * NUM_BLOCKS):
        w = 0.1 * jax.random.normal(keys[1 + 2 * i], (KSIZE, KSIZE, C, C),
                                    jnp.float32)
        b = 0.1 * jax.random.normal(keys[2 + 2 * i], (C,), jnp.float32)
        weights.append(w)
        biases.append(b)

    out = multires_block(x, weights, biases)
    out = jax.block_until_ready(out)

    ref = multires_block_reference(x, weights, biases)
    err = float(jnp.max(jnp.abs(out - ref)))
    assert out.shape == (N, C, H, W) and out.dtype == jnp.float32
    assert jnp.allclose(out, ref, atol=1e-4, rtol=1e-4), f"max err {err}"

    print("KERNEL_OK")
</pallas_src>

<mosaic_0001>
module attributes {stable_mosaic.version = 11 : i64} {
  func.func @probe(%arg0: memref<8x128xf32, #tpu.memory_space<vmem>>, %arg1: memref<8x128xf32, #tpu.memory_space<vmem>>) attributes {dimension_semantics = [], scalar_prefetch = 0 : i64, scratch_operands = 0 : i64, tpu.core_type = #tpu.core_type<tc>} {
    %c0 = arith.constant 0 : index
    %c0_0 = arith.constant 0 : index
    %0 = vector.load %arg0[%c0, %c0_0] : memref<8x128xf32, #tpu.memory_space<vmem>>, vector<8x128xf32>
    %c1_i32 = arith.constant 1 : i32
    %1 = tpu.dynamic_rotate %0 by %c1_i32 dim 1 : vector<8x128xf32>, i32 -> vector<8x128xf32>
    %c0_1 = arith.constant 0 : index
    %c0_2 = arith.constant 0 : index
    %2 = vector.load %arg1[%c0_1, %c0_2] : memref<8x128xf32, #tpu.memory_space<vmem>>, vector<8x128xf32>
    tpu.vector_store %arg1[%c0_1, %c0_2], %1 {strides = array<i32>} : memref<8x128xf32, #tpu.memory_space<vmem>>, vector<8x128xf32>,
    return
  }
}

</mosaic_0001>

<bundles_post_ra>
// kernel: tpu_custom_call.1
= control target key start
LH: loop header
LB: loop body
LE: loop exit
PB: predicated region body
PF: predicated region fallthrough
CT: control target
= control target key end

     0   :  { %6 = vsyncpa [#allocation3], 0  ;;  %s128_s0 = inlined_call_operand.hbm [shape: f32[8,128], index: 0, kind: input, shape index: {}]   ;;  %s129_s1 = inlined_call_operand.hbm [shape: f32[8,128], index: 1, kind: output, shape index: {}]  }
   0x1   :  { %7 = vsyncpa [#allocation4], 0  ;;  %s91_s6 = smov [#allocation2]   ;;  %s43_s10 = scalar_lea.hbm %s128_s0, 128 }
   0x2   :  { %s14_s7 = sshll.u32 %s91_s6, 4  ;;  %p44_p0 = scmp.ne.s32.totalorder %s128_s0, %s43_s10  ;;  %s15_s7 = int_to_ptr.vmem [resolvable:$true] %s14_s7 }
   0x3   :  { %p47_p1 = scmp.lt.u32.totalorder %s43_s10, %s128_s0 }
   0x5   :  { %p49_p2 = pnand %p47_p1, %p44_p0 }
   0x7   :  { %52 = shalt.err (!%p49_p2)
}
   0x8   :  { %s53_s15 = scalar_lea.vmem %s15_s7, 128  ;;  %p58_p4 = scmp.lt.s32.totalorder %s15_s7, %s15_s7 }
   0x9   :  { %p54_p3 = scmp.ne.s32.totalorder %s15_s7, %s53_s15  ;;  %p59_p5 = scmp.lt.s32.totalorder %s53_s15, %s53_s15 }
   0xb   :  { %p60_p6 = por %p59_p5, %p58_p4 }
   0xd   :  { %p61_p7 = pnand %p60_p6, %p54_p3 }
   0xf   :  { %64 = shalt.err (!%p61_p7)
}
  0x10   :  { %17 = dma.hbm_to_vmem [thread:$0]  %s128_s0, 128, %s15_s7, [#allocation3]  }
  0x11   :  { %87 = dma.done.wait [#allocation3], 128  }
  0x12   :  { %88 = vsyncadd [#allocation3], 4294967168  ;;  %v21_v0 = vld [vmem:[#allocation2] sm:$0xff]  ;;  %s92_s18 = smov 1   ;;  %s93_s19 = smov [#allocation5]  }
  0x13   :  { %22 = vrot.lane.b32.xlu0 %v21_v0, %s92_s18  ;;  %s31_s20 = sshll.u32 %s93_s19, 4  ;;  %s32_s20 = int_to_ptr.vmem [resolvable:$true] %s31_s20 }
  0x14   :  { %s65_s21 = scalar_lea.vmem %s32_s20, 128  ;;  %p70_p9 = scmp.lt.s32.totalorder %s32_s20, %s32_s20 }
  0x15   :  { %p66_p8 = scmp.ne.s32.totalorder %s32_s20, %s65_s21  ;;  %p71_p10 = scmp.lt.s32.totalorder %s65_s21, %s65_s21 }
  0x17   :  { %p72_p11 = por %p71_p10, %p70_p9 }
  0x19   :  { %p73_p12 = pnand %p72_p11, %p66_p8 }
  0x85   :  { %v23_v1 = vpop.permute.xlu0 %22 }
  0x86   :  { %24 = vst [vmem:[#allocation5] sm:$0xff] %v23_v1 }
  0x87   :  { %76 = shalt.err (!%p73_p12)
}
  0x88   :  { %s77_s0 = scalar_lea.hbm %s129_s1, 128 }
  0x89   :  { %p78_p13 = scmp.ne.s32.totalorder %s129_s1, %s77_s0  ;;  %p81_p0 = scmp.lt.u32.totalorder %s77_s0, %s129_s1 }
  0x8b   :  { %p83_p1 = pnand %p81_p0, %p78_p13 }
  0x8d   :  { %86 = shalt.err (!%p83_p1)
}
  0x8e   :  { %34 = dma.vmem_to_hbm [thread:$0]  %s32_s20, 128, %s129_s1, [#allocation4]  }
  0x8f   :  { %89 = dma.done.wait [#allocation4], 128  }
  0x90   :  { %90 = vsyncadd [#allocation4], 4294967168 }
  0x91   :  { %38 = vsyncpa [#allocation3], 1 }
  0x92   :  { %39 = vsyncpa [#allocation4], 1 }

</bundles_post_ra>
